<compile_context>
chip_gen: v7x
topology: tpu7x:2x2x1
jax: 0.10.0
libtpu: 0.0.40
codegen_flags: <defaults>
</compile_context>

<pallas_src>
import functools

import numpy as np
import jax
import jax.numpy as jnp
from jax import lax
from jax.experimental import pallas as pl
from jax.experimental.pallas import tpu as pltpu


def _mha_norm_kernel(src_ref, mask_ref,
                     wqkv_ref, bqkv_ref,
                     wo_ref, bo_ref,
                     gamma_ref, beta_ref,
                     out_ref,
                     *, nhead, head_dim, eps, tb, seq, compute_dtype):
    d = nhead * head_dim
    rows = tb * seq

    x = src_ref[...]                                   # (tb, S, D) f32
    x2 = x.reshape(rows, d)                            # stack batches along sublanes

    # ---- fused QKV projection: one (tb*S, D) x (D, 3D) MXU matmul, f32 accumulation ----
    qkv = jnp.dot(x2.astype(compute_dtype), wqkv_ref[...],
                  preferred_element_type=jnp.float32) + bqkv_ref[...]   # (tb*S, 3D) f32

    # Scale folded into q once; key-padding bias computed once per block.
    scale = jnp.float32(1.0 / (head_dim ** 0.5))
    q = (qkv[:, 0:d] * scale).astype(compute_dtype).reshape(tb, seq, d)
    k = qkv[:, d:2 * d].astype(compute_dtype).reshape(tb, seq, d)
    v = qkv[:, 2 * d:3 * d].astype(compute_dtype).reshape(tb, seq, d)
    bias = mask_ref[...] * jnp.float32(-1e9)           # (tb, 1, S) broadcasts over queries

    # Accumulator starts as residual + output-projection bias; each head adds its
    # already-projected context (no ctx scratch, no narrow-lane stores).
    acc = x + bo_ref[...]                               # (tb, S, D) f32

    # Static loop over heads only (nhead is a small trace-time constant); everything
    # inside is batched over tb, so softmax runs as one (tb, S, S) vectorized pass.
    for h in range(nhead):
        lo = h * head_dim
        hi = lo + head_dim
        qh = q[:, :, lo:hi]                             # (tb, S, hd)
        kh = k[:, :, lo:hi]
        vh = v[:, :, lo:hi]

        s = jnp.einsum('bqd,bkd->bqk', qh, kh,
                       preferred_element_type=jnp.float32) + bias       # (tb, S, S) f32
        m = jnp.max(s, axis=-1, keepdims=True)
        p = jnp.exp(s - m)
        inv = pl.reciprocal(jnp.sum(p, axis=-1, keepdims=True), approx=True)
        p = (p * inv).astype(compute_dtype)

        ctx_h = jnp.einsum('bqk,bkd->bqd', p, vh,
                           preferred_element_type=jnp.float32)           # (tb, S, hd)
        # Per-head output projection accumulation: Wo row-slice [lo:hi, :] is the
        # head's rows of the pre-transposed Wo^T.
        acc = acc + jnp.einsum('bqd,de->bqe', ctx_h.astype(compute_dtype),
                               wo_ref[lo:hi, :],
                               preferred_element_type=jnp.float32)       # (tb, S, D)

    # ---- LayerNorm (residual already folded into acc), one-pass statistics ----
    y = acc
    mean = jnp.mean(y, axis=-1, keepdims=True)
    msq = jnp.mean(y * y, axis=-1, keepdims=True)
    var = jnp.maximum(msq - mean * mean, 0.0)           # clamp against cancellation
    yn = (y - mean) * lax.rsqrt(var + jnp.float32(eps))
    out = yn * gamma_ref[...] + beta_ref[...]
    out_ref[...] = out.astype(out_ref.dtype)


def prepare_mha_norm_params(params, *, compute_dtype=jnp.bfloat16):
    """One-time parameter preparation (hoisted out of the per-call path):
    pre-transpose + fuse the QKV weights and cast weights to the compute dtype."""
    D = params["wq"].shape[0]
    wqkv = jnp.concatenate(
        [params["wq"].T, params["wk"].T, params["wv"].T], axis=1).astype(compute_dtype)
    bqkv = jnp.concatenate(
        [params["bq"], params["bk"], params["bv"]]).reshape(1, 3 * D).astype(jnp.float32)
    return {
        "wqkv": wqkv,                                           # (D, 3D) compute dtype
        "bqkv": bqkv,                                           # (1, 3D) f32
        "wo_t": params["wo"].T.astype(compute_dtype),           # (D, D)  compute dtype
        "bo": params["bo"].reshape(1, D).astype(jnp.float32),
        "gamma": params["gamma"].reshape(1, D).astype(jnp.float32),
        "beta": params["beta"].reshape(1, D).astype(jnp.float32),
    }


def _default_batch_block(B):
    """Pick the largest batch block that still yields >= 2 grid steps (~4 preferred):
    with dimension_semantics=('parallel',) this lets v7x shard across its 2 TensorCores
    and lets the BlockSpec pipeline overlap src/out DMA with compute."""
    if B <= 1:
        return max(B, 1)
    target_steps = min(B, 4)
    for tb in range(max(B // target_steps, 1), 0, -1):
        if B % tb == 0 and B // tb >= 2:
            return tb
    return 1


def _vmem_limit_bytes(tb, S, D, out_itemsize):
    """Explicit scoped-VMEM budget: double-buffered src/out/mask blocks, single-buffered
    bf16 weights, in-kernel transients (qkv, q/k/v, per-head scores), plus headroom.
    Clamped so it is valid on v5e/v6e (128 MiB physical) and v7x (64 MiB physical)."""
    lane = 128
    Dp = max(D, lane)
    Sp = max(S, lane)
    blk = tb * S * Dp
    est = (2 * blk * 4                        # src block, double-buffered, f32
           + 2 * blk * out_itemsize           # out block, double-buffered
           + 2 * tb * Sp * 4                  # mask block, double-buffered
           + 4 * Dp * Dp * 2                  # wqkv + wo (bf16), single-buffered
           + blk * 3 * 4 + blk * 3 * 2        # qkv f32 + q/k/v compute-dtype copies
           + 4 * tb * S * Sp * 4              # score/softmax transients
           + 2 * blk * 4)                     # accumulator + misc
    est = int(est * 2) + (8 << 20)            # 2x headroom + compiler temporaries
    return min(max(est, 32 << 20), 48 << 20)


def multihead_attention_and_norm(src, key_padding_mask, prepared, *, nhead,
                                 eps=1e-5, batch_block=None,
                                 compute_dtype=jnp.bfloat16,
                                 out_dtype=jnp.bfloat16):
    B, S, D = src.shape
    assert D % nhead == 0
    head_dim = D // nhead
    tb = _default_batch_block(B) if batch_block is None else batch_block
    assert B % tb == 0

    mask_f = key_padding_mask.astype(jnp.float32).reshape(B, 1, S)

    kernel = functools.partial(
        _mha_norm_kernel, nhead=nhead, head_dim=head_dim, eps=eps,
        tb=tb, seq=S, compute_dtype=compute_dtype)

    def invariant(shape):
        # Grid-invariant blocks (constant index_map): request single buffering to
        # recover VMEM headroom vs. the default double-buffering.
        try:
            return pl.BlockSpec(shape, lambda b: (0, 0), pipeline_mode=pl.Buffered(1))
        except TypeError:   # older BlockSpec signature without pipeline_mode
            return pl.BlockSpec(shape, lambda b: (0, 0))

    return pl.pallas_call(
        kernel,
        out_shape=jax.ShapeDtypeStruct((B, S, D), out_dtype),
        grid_spec=pltpu.PrefetchScalarGridSpec(
            num_scalar_prefetch=0,
            grid=(B // tb,),
            in_specs=[
                pl.BlockSpec((tb, S, D), lambda b: (b, 0, 0)),   # src
                pl.BlockSpec((tb, 1, S), lambda b: (b, 0, 0)),   # key-padding mask (f32)
                invariant((D, 3 * D)),    # fused, pre-transposed QKV weight
                invariant((1, 3 * D)),    # fused QKV bias
                invariant((D, D)),        # Wo^T
                invariant((1, D)),        # bo
                invariant((1, D)),        # gamma
                invariant((1, D)),        # beta
            ],
            out_specs=pl.BlockSpec((tb, S, D), lambda b: (b, 0, 0)),
        ),
        compiler_params=pltpu.CompilerParams(
            dimension_semantics=("parallel",),
            vmem_limit_bytes=_vmem_limit_bytes(tb, S, D, np.dtype(out_dtype).itemsize)),
    )(src, mask_f, prepared["wqkv"], prepared["bqkv"], prepared["wo_t"],
      prepared["bo"], prepared["gamma"], prepared["beta"])


def _reference(src, key_padding_mask, params, *, nhead, eps=1e-5):
    # Pure-JAX f32 reference mirroring torch.nn.MultiheadAttention (eval) + LayerNorm.
    B, S, D = src.shape
    hd = D // nhead
    q = src @ params["wq"].T + params["bq"]
    k = src @ params["wk"].T + params["bk"]
    v = src @ params["wv"].T + params["bv"]
    q = q.reshape(B, S, nhead, hd).transpose(0, 2, 1, 3)
    k = k.reshape(B, S, nhead, hd).transpose(0, 2, 1, 3)
    v = v.reshape(B, S, nhead, hd).transpose(0, 2, 1, 3)
    s = jnp.einsum("bhqd,bhkd->bhqk", q, k) / jnp.sqrt(jnp.float32(hd))
    m = key_padding_mask.astype(jnp.float32)[:, None, None, :] * (-1e9)
    p = jax.nn.softmax(s + m, axis=-1)
    ctx = jnp.einsum("bhqk,bhkd->bhqd", p, v).transpose(0, 2, 1, 3).reshape(B, S, D)
    attn = ctx @ params["wo"].T + params["bo"]
    y = attn + src
    mu = y.mean(-1, keepdims=True)
    var = ((y - mu) ** 2).mean(-1, keepdims=True)
    return (y - mu) / jnp.sqrt(var + eps) * params["gamma"] + params["beta"]


if __name__ == "__main__":
    # Small shapes consistent with the module: batch=2, seq=8, d_model=32, nhead=4.
    B, S, D, NHEAD = 2, 8, 32, 4

    ks = jax.random.split(jax.random.PRNGKey(0), 9)
    wscale = 1.0 / jnp.sqrt(jnp.float32(D))
    params = {
        "wq": jax.random.normal(ks[0], (D, D), jnp.float32) * wscale,
        "wk": jax.random.normal(ks[1], (D, D), jnp.float32) * wscale,
        "wv": jax.random.normal(ks[2], (D, D), jnp.float32) * wscale,
        "bq": jax.random.normal(ks[3], (D,), jnp.float32) * 0.02,
        "bk": jax.random.normal(ks[4], (D,), jnp.float32) * 0.02,
        "bv": jax.random.normal(ks[5], (D,), jnp.float32) * 0.02,
        "wo": jax.random.normal(ks[6], (D, D), jnp.float32) * wscale,
        "bo": jnp.zeros((D,), jnp.float32),
        "gamma": jnp.ones((D,), jnp.float32),
        "beta": jnp.zeros((D,), jnp.float32),
    }

    src = jax.random.normal(ks[8], (B, S, D), jnp.float32)
    # True = padded key position (last two positions of batch 1 are padded).
    key_padding_mask = jnp.zeros((B, S), dtype=bool).at[1, -2:].set(True)

    # One-time weight preparation (hoisted out of the per-call path).
    prepared = prepare_mha_norm_params(params)

    out = multihead_attention_and_norm(src, key_padding_mask, prepared, nhead=NHEAD)
    out = jax.block_until_ready(out)

    ref = _reference(src, key_padding_mask, params, nhead=NHEAD)
    assert out.shape == (B, S, D)
    # Tolerance sized for bf16 MXU inputs + bf16 output with f32 accumulation and
    # f32 softmax/LayerNorm statistics.
    assert jnp.allclose(out.astype(jnp.float32), ref, atol=3e-2, rtol=3e-2), \
        "mismatch vs reference"

    print("KERNEL_OK")
</pallas_src>

<mosaic_0001>
module attributes {stable_mosaic.version = 11 : i64} {
  func.func @_mha_norm_kernel(%arg0: i32, %arg1: memref<1x8x32xf32, #tpu.memory_space<vmem>>, %arg2: memref<1x1x8xf32, #tpu.memory_space<vmem>>, %arg3: memref<32x96xbf16, #tpu.memory_space<vmem>>, %arg4: memref<1x96xf32, #tpu.memory_space<vmem>>, %arg5: memref<32x32xbf16, #tpu.memory_space<vmem>>, %arg6: memref<1x32xf32, #tpu.memory_space<vmem>>, %arg7: memref<1x32xf32, #tpu.memory_space<vmem>>, %arg8: memref<1x32xf32, #tpu.memory_space<vmem>>, %arg9: memref<1x8x32xbf16, #tpu.memory_space<vmem>>) attributes {dimension_semantics = [#tpu.dimension_semantics<parallel>], iteration_bounds = array<i64: 2>, scalar_prefetch = 0 : i64, scratch_operands = 0 : i64, tpu.core_type = #tpu.core_type<tc>, window_params = [{transform_indices = @transform_0, window_bounds = array<i64: 1, 8, 32>}, {transform_indices = @transform_1, window_bounds = array<i64: 1, 1, 8>}, {pipeline_mode = #tpu.pipeline_mode<synchronous>, transform_indices = @transform_2, window_bounds = array<i64: 32, 96>}, {pipeline_mode = #tpu.pipeline_mode<synchronous>, transform_indices = @transform_3, window_bounds = array<i64: 1, 96>}, {pipeline_mode = #tpu.pipeline_mode<synchronous>, transform_indices = @transform_4, window_bounds = array<i64: 32, 32>}, {pipeline_mode = #tpu.pipeline_mode<synchronous>, transform_indices = @transform_5, window_bounds = array<i64: 1, 32>}, {pipeline_mode = #tpu.pipeline_mode<synchronous>, transform_indices = @transform_6, window_bounds = array<i64: 1, 32>}, {pipeline_mode = #tpu.pipeline_mode<synchronous>, transform_indices = @transform_7, window_bounds = array<i64: 1, 32>}, {transform_indices = @transform_8, window_bounds = array<i64: 1, 8, 32>}]} {
    %c0 = arith.constant 0 : index
    %c0_0 = arith.constant 0 : index
    %c0_1 = arith.constant 0 : index
    %0 = vector.load %arg1[%c0, %c0_0, %c0_1] : memref<1x8x32xf32, #tpu.memory_space<vmem>>, vector<1x8x32xf32>
    %1 = vector.shape_cast %0 : vector<1x8x32xf32> to vector<8x32xf32>
    %2 = arith.truncf %1 : vector<8x32xf32> to vector<8x32xbf16>
    %c0_2 = arith.constant 0 : index
    %c0_3 = arith.constant 0 : index
    %3 = vector.load %arg3[%c0_2, %c0_3] : memref<32x96xbf16, #tpu.memory_space<vmem>>, vector<32x96xbf16>
    %cst = arith.constant dense<0.000000e+00> : vector<8x96xf32>
    %4 = tpu.matmul %2, %3, %cst {dimension_numbers = #tpu.dot_dimension_numbers<[1], [0], [0], [1], [0, 0, 1, 1], [], []>} : vector<8x32xbf16>, vector<32x96xbf16>, vector<8x96xf32> -> vector<8x96xf32>
    %c0_4 = arith.constant 0 : index
    %c0_5 = arith.constant 0 : index
    %5 = vector.load %arg4[%c0_4, %c0_5] : memref<1x96xf32, #tpu.memory_space<vmem>>, vector<1x96xf32>
    %6 = vector.broadcast %5 : vector<1x96xf32> to vector<8x96xf32>
    %7 = arith.addf %4, %6 : vector<8x96xf32>
    %8 = vector.extract_strided_slice %7 {offsets = [0, 0], sizes = [8, 32], strides = [1, 1]} : vector<8x96xf32> to vector<8x32xf32>
    %cst_6 = arith.constant 0.353553385 : f32
    %9 = vector.broadcast %cst_6 : f32 to vector<8x32xf32>
    %10 = arith.mulf %8, %9 : vector<8x32xf32>
    %11 = arith.truncf %10 : vector<8x32xf32> to vector<8x32xbf16>
    %12 = vector.shape_cast %11 : vector<8x32xbf16> to vector<1x8x32xbf16>
    %13 = vector.extract_strided_slice %7 {offsets = [0, 32], sizes = [8, 32], strides = [1, 1]} : vector<8x96xf32> to vector<8x32xf32>
    %14 = arith.truncf %13 : vector<8x32xf32> to vector<8x32xbf16>
    %15 = vector.shape_cast %14 : vector<8x32xbf16> to vector<1x8x32xbf16>
    %16 = vector.extract_strided_slice %7 {offsets = [0, 64], sizes = [8, 32], strides = [1, 1]} : vector<8x96xf32> to vector<8x32xf32>
    %17 = arith.truncf %16 : vector<8x32xf32> to vector<8x32xbf16>
    %18 = vector.shape_cast %17 : vector<8x32xbf16> to vector<1x8x32xbf16>
    %c0_7 = arith.constant 0 : index
    %c0_8 = arith.constant 0 : index
    %c0_9 = arith.constant 0 : index
    %19 = vector.load %arg2[%c0_7, %c0_8, %c0_9] : memref<1x1x8xf32, #tpu.memory_space<vmem>>, vector<1x1x8xf32>
    %cst_10 = arith.constant -1.000000e+09 : f32
    %20 = vector.broadcast %cst_10 : f32 to vector<1x1x8xf32>
    %21 = arith.mulf %19, %20 : vector<1x1x8xf32>
    %c0_11 = arith.constant 0 : index
    %c0_12 = arith.constant 0 : index
    %22 = vector.load %arg6[%c0_11, %c0_12] : memref<1x32xf32, #tpu.memory_space<vmem>>, vector<1x32xf32>
    %23 = vector.shape_cast %22 : vector<1x32xf32> to vector<1x1x32xf32>
    %24 = vector.broadcast %23 : vector<1x1x32xf32> to vector<1x8x32xf32>
    %25 = arith.addf %0, %24 : vector<1x8x32xf32>
    %26 = vector.extract_strided_slice %12 {offsets = [0, 0, 0], sizes = [1, 8, 8], strides = [1, 1, 1]} : vector<1x8x32xbf16> to vector<1x8x8xbf16>
    %27 = vector.extract_strided_slice %15 {offsets = [0, 0, 0], sizes = [1, 8, 8], strides = [1, 1, 1]} : vector<1x8x32xbf16> to vector<1x8x8xbf16>
    %28 = vector.extract_strided_slice %18 {offsets = [0, 0, 0], sizes = [1, 8, 8], strides = [1, 1, 1]} : vector<1x8x32xbf16> to vector<1x8x8xbf16>
    "tpu.trace_start"() <{level = 10 : i32, message = "bqd,bkd->bqk"}> : () -> ()
    %cst_13 = arith.constant dense<0.000000e+00> : vector<1x8x8xf32>
    %29 = tpu.matmul %26, %27, %cst_13 {dimension_numbers = #tpu.dot_dimension_numbers<[2], [2], [1], [1], [0, 0, 0, 1, 1, 1], [0], [0]>} : vector<1x8x8xbf16>, vector<1x8x8xbf16>, vector<1x8x8xf32> -> vector<1x8x8xf32>
    "tpu.trace_stop"() : () -> ()
    %30 = vector.broadcast %21 : vector<1x1x8xf32> to vector<1x8x8xf32>
    %31 = arith.addf %29, %30 : vector<1x8x8xf32>
    %cst_14 = arith.constant dense<0xFF800000> : vector<1x8xf32>
    %32 = vector.multi_reduction <maximumf>, %31, %cst_14 [2] : vector<1x8x8xf32> to vector<1x8xf32>
    %33 = vector.shape_cast %32 : vector<1x8xf32> to vector<1x8x1xf32>
    %34 = vector.broadcast %33 : vector<1x8x1xf32> to vector<1x8x8xf32>
    %35 = arith.subf %31, %34 : vector<1x8x8xf32>
    %36 = math.exp %35 : vector<1x8x8xf32>
    %cst_15 = arith.constant dense<0.000000e+00> : vector<1x8xf32>
    %37 = vector.multi_reduction <add>, %36, %cst_15 [2] : vector<1x8x8xf32> to vector<1x8xf32>
    %38 = vector.shape_cast %37 : vector<1x8xf32> to vector<1x8x1xf32>
    %39 = tpu.reciprocal %38 {approx = true} : vector<1x8x1xf32> -> vector<1x8x1xf32>
    %40 = vector.broadcast %39 : vector<1x8x1xf32> to vector<1x8x8xf32>
    %41 = arith.mulf %36, %40 : vector<1x8x8xf32>
    %42 = arith.truncf %41 : vector<1x8x8xf32> to vector<1x8x8xbf16>
    "tpu.trace_start"() <{level = 10 : i32, message = "bqk,bkd->bqd"}> : () -> ()
    %cst_16 = arith.constant dense<0.000000e+00> : vector<1x8x8xf32>
    %43 = tpu.matmul %42, %28, %cst_16 {dimension_numbers = #tpu.dot_dimension_numbers<[2], [1], [1], [2], [0, 0, 0, 1, 1, 2], [0], [0]>} : vector<1x8x8xbf16>, vector<1x8x8xbf16>, vector<1x8x8xf32> -> vector<1x8x8xf32>
    "tpu.trace_stop"() : () -> ()
    %44 = arith.truncf %43 : vector<1x8x8xf32> to vector<1x8x8xbf16>
    %c0_17 = arith.constant 0 : index
    %c0_18 = arith.constant 0 : index
    %45 = vector.load %arg5[%c0_17, %c0_18] : memref<32x32xbf16, #tpu.memory_space<vmem>>, vector<8x32xbf16>
    "tpu.trace_start"() <{level = 10 : i32, message = "bqd,de->bqe"}> : () -> ()
    %cst_19 = arith.constant dense<0.000000e+00> : vector<1x8x32xf32>
    %46 = tpu.matmul %44, %45, %cst_19 {dimension_numbers = #tpu.dot_dimension_numbers<[2], [0], [0, 1], [1], [0, 0, 0, 1, 1, 1], [], []>} : vector<1x8x8xbf16>, vector<8x32xbf16>, vector<1x8x32xf32> -> vector<1x8x32xf32>
    "tpu.trace_stop"() : () -> ()
    %47 = arith.addf %25, %46 : vector<1x8x32xf32>
    %48 = vector.extract_strided_slice %12 {offsets = [0, 0, 8], sizes = [1, 8, 8], strides = [1, 1, 1]} : vector<1x8x32xbf16> to vector<1x8x8xbf16>
    %49 = vector.extract_strided_slice %15 {offsets = [0, 0, 8], sizes = [1, 8, 8], strides = [1, 1, 1]} : vector<1x8x32xbf16> to vector<1x8x8xbf16>
    %50 = vector.extract_strided_slice %18 {offsets = [0, 0, 8], sizes = [1, 8, 8], strides = [1, 1, 1]} : vector<1x8x32xbf16> to vector<1x8x8xbf16>
    "tpu.trace_start"() <{level = 10 : i32, message = "bqd,bkd->bqk"}> : () -> ()
    %cst_20 = arith.constant dense<0.000000e+00> : vector<1x8x8xf32>
    %51 = tpu.matmul %48, %49, %cst_20 {dimension_numbers = #tpu.dot_dimension_numbers<[2], [2], [1], [1], [0, 0, 0, 1, 1, 1], [0], [0]>} : vector<1x8x8xbf16>, vector<1x8x8xbf16>, vector<1x8x8xf32> -> vector<1x8x8xf32>
    "tpu.trace_stop"() : () -> ()
    %52 = vector.broadcast %21 : vector<1x1x8xf32> to vector<1x8x8xf32>
    %53 = arith.addf %51, %52 : vector<1x8x8xf32>
    %cst_21 = arith.constant dense<0xFF800000> : vector<1x8xf32>
    %54 = vector.multi_reduction <maximumf>, %53, %cst_21 [2] : vector<1x8x8xf32> to vector<1x8xf32>
    %55 = vector.shape_cast %54 : vector<1x8xf32> to vector<1x8x1xf32>
    %56 = vector.broadcast %55 : vector<1x8x1xf32> to vector<1x8x8xf32>
    %57 = arith.subf %53, %56 : vector<1x8x8xf32>
    %58 = math.exp %57 : vector<1x8x8xf32>
    %cst_22 = arith.constant dense<0.000000e+00> : vector<1x8xf32>
    %59 = vector.multi_reduction <add>, %58, %cst_22 [2] : vector<1x8x8xf32> to vector<1x8xf32>
    %60 = vector.shape_cast %59 : vector<1x8xf32> to vector<1x8x1xf32>
    %61 = tpu.reciprocal %60 {approx = true} : vector<1x8x1xf32> -> vector<1x8x1xf32>
    %62 = vector.broadcast %61 : vector<1x8x1xf32> to vector<1x8x8xf32>
    %63 = arith.mulf %58, %62 : vector<1x8x8xf32>
    %64 = arith.truncf %63 : vector<1x8x8xf32> to vector<1x8x8xbf16>
    "tpu.trace_start"() <{level = 10 : i32, message = "bqk,bkd->bqd"}> : () -> ()
    %cst_23 = arith.constant dense<0.000000e+00> : vector<1x8x8xf32>
    %65 = tpu.matmul %64, %50, %cst_23 {dimension_numbers = #tpu.dot_dimension_numbers<[2], [1], [1], [2], [0, 0, 0, 1, 1, 2], [0], [0]>} : vector<1x8x8xbf16>, vector<1x8x8xbf16>, vector<1x8x8xf32> -> vector<1x8x8xf32>
    "tpu.trace_stop"() : () -> ()
    %66 = arith.truncf %65 : vector<1x8x8xf32> to vector<1x8x8xbf16>
    %c8 = arith.constant 8 : index
    %c0_24 = arith.constant 0 : index
    %67 = vector.load %arg5[%c8, %c0_24] : memref<32x32xbf16, #tpu.memory_space<vmem>>, vector<8x32xbf16>
    "tpu.trace_start"() <{level = 10 : i32, message = "bqd,de->bqe"}> : () -> ()
    %cst_25 = arith.constant dense<0.000000e+00> : vector<1x8x32xf32>
    %68 = tpu.matmul %66, %67, %cst_25 {dimension_numbers = #tpu.dot_dimension_numbers<[2], [0], [0, 1], [1], [0, 0, 0, 1, 1, 1], [], []>} : vector<1x8x8xbf16>, vector<8x32xbf16>, vector<1x8x32xf32> -> vector<1x8x32xf32>
    "tpu.trace_stop"() : () -> ()
    %69 = arith.addf %47, %68 : vector<1x8x32xf32>
    %70 = vector.extract_strided_slice %12 {offsets = [0, 0, 16], sizes = [1, 8, 8], strides = [1, 1, 1]} : vector<1x8x32xbf16> to vector<1x8x8xbf16>
    %71 = vector.extract_strided_slice %15 {offsets = [0, 0, 16], sizes = [1, 8, 8], strides = [1, 1, 1]} : vector<1x8x32xbf16> to vector<1x8x8xbf16>
    %72 = vector.extract_strided_slice %18 {offsets = [0, 0, 16], sizes = [1, 8, 8], strides = [1, 1, 1]} : vector<1x8x32xbf16> to vector<1x8x8xbf16>
    "tpu.trace_start"() <{level = 10 : i32, message = "bqd,bkd->bqk"}> : () -> ()
    %cst_26 = arith.constant dense<0.000000e+00> : vector<1x8x8xf32>
    %73 = tpu.matmul %70, %71, %cst_26 {dimension_numbers = #tpu.dot_dimension_numbers<[2], [2], [1], [1], [0, 0, 0, 1, 1, 1], [0], [0]>} : vector<1x8x8xbf16>, vector<1x8x8xbf16>, vector<1x8x8xf32> -> vector<1x8x8xf32>
    "tpu.trace_stop"() : () -> ()
    %74 = vector.broadcast %21 : vector<1x1x8xf32> to vector<1x8x8xf32>
    %75 = arith.addf %73, %74 : vector<1x8x8xf32>
    %cst_27 = arith.constant dense<0xFF800000> : vector<1x8xf32>
    %76 = vector.multi_reduction <maximumf>, %75, %cst_27 [2] : vector<1x8x8xf32> to vector<1x8xf32>
    %77 = vector.shape_cast %76 : vector<1x8xf32> to vector<1x8x1xf32>
    %78 = vector.broadcast %77 : vector<1x8x1xf32> to vector<1x8x8xf32>
    %79 = arith.subf %75, %78 : vector<1x8x8xf32>
    %80 = math.exp %79 : vector<1x8x8xf32>
    %cst_28 = arith.constant dense<0.000000e+00> : vector<1x8xf32>
    %81 = vector.multi_reduction <add>, %80, %cst_28 [2] : vector<1x8x8xf32> to vector<1x8xf32>
    %82 = vector.shape_cast %81 : vector<1x8xf32> to vector<1x8x1xf32>
    %83 = tpu.reciprocal %82 {approx = true} : vector<1x8x1xf32> -> vector<1x8x1xf32>
    %84 = vector.broadcast %83 : vector<1x8x1xf32> to vector<1x8x8xf32>
    %85 = arith.mulf %80, %84 : vector<1x8x8xf32>
    %86 = arith.truncf %85 : vector<1x8x8xf32> to vector<1x8x8xbf16>
    "tpu.trace_start"() <{level = 10 : i32, message = "bqk,bkd->bqd"}> : () -> ()
    %cst_29 = arith.constant dense<0.000000e+00> : vector<1x8x8xf32>
    %87 = tpu.matmul %86, %72, %cst_29 {dimension_numbers = #tpu.dot_dimension_numbers<[2], [1], [1], [2], [0, 0, 0, 1, 1, 2], [0], [0]>} : vector<1x8x8xbf16>, vector<1x8x8xbf16>, vector<1x8x8xf32> -> vector<1x8x8xf32>
    "tpu.trace_stop"() : () -> ()
    %88 = arith.truncf %87 : vector<1x8x8xf32> to vector<1x8x8xbf16>
    %c16 = arith.constant 16 : index
    %c0_30 = arith.constant 0 : index
    %89 = vector.load %arg5[%c16, %c0_30] : memref<32x32xbf16, #tpu.memory_space<vmem>>, vector<8x32xbf16>
    "tpu.trace_start"() <{level = 10 : i32, message = "bqd,de->bqe"}> : () -> ()
    %cst_31 = arith.constant dense<0.000000e+00> : vector<1x8x32xf32>
    %90 = tpu.matmul %88, %89, %cst_31 {dimension_numbers = #tpu.dot_dimension_numbers<[2], [0], [0, 1], [1], [0, 0, 0, 1, 1, 1], [], []>} : vector<1x8x8xbf16>, vector<8x32xbf16>, vector<1x8x32xf32> -> vector<1x8x32xf32>
    "tpu.trace_stop"() : () -> ()
    %91 = arith.addf %69, %90 : vector<1x8x32xf32>
    %92 = vector.extract_strided_slice %12 {offsets = [0, 0, 24], sizes = [1, 8, 8], strides = [1, 1, 1]} : vector<1x8x32xbf16> to vector<1x8x8xbf16>
    %93 = vector.extract_strided_slice %15 {offsets = [0, 0, 24], sizes = [1, 8, 8], strides = [1, 1, 1]} : vector<1x8x32xbf16> to vector<1x8x8xbf16>
    %94 = vector.extract_strided_slice %18 {offsets = [0, 0, 24], sizes = [1, 8, 8], strides = [1, 1, 1]} : vector<1x8x32xbf16> to vector<1x8x8xbf16>
    "tpu.trace_start"() <{level = 10 : i32, message = "bqd,bkd->bqk"}> : () -> ()
    %cst_32 = arith.constant dense<0.000000e+00> : vector<1x8x8xf32>
    %95 = tpu.matmul %92, %93, %cst_32 {dimension_numbers = #tpu.dot_dimension_numbers<[2], [2], [1], [1], [0, 0, 0, 1, 1, 1], [0], [0]>} : vector<1x8x8xbf16>, vector<1x8x8xbf16>, vector<1x8x8xf32> -> vector<1x8x8xf32>
    "tpu.trace_stop"() : () -> ()
    %96 = vector.broadcast %21 : vector<1x1x8xf32> to vector<1x8x8xf32>
    %97 = arith.addf %95, %96 : vector<1x8x8xf32>
    %cst_33 = arith.constant dense<0xFF800000> : vector<1x8xf32>
    %98 = vector.multi_reduction <maximumf>, %97, %cst_33 [2] : vector<1x8x8xf32> to vector<1x8xf32>
    %99 = vector.shape_cast %98 : vector<1x8xf32> to vector<1x8x1xf32>
    %100 = vector.broadcast %99 : vector<1x8x1xf32> to vector<1x8x8xf32>
    %101 = arith.subf %97, %100 : vector<1x8x8xf32>
    %102 = math.exp %101 : vector<1x8x8xf32>
    %cst_34 = arith.constant dense<0.000000e+00> : vector<1x8xf32>
    %103 = vector.multi_reduction <add>, %102, %cst_34 [2] : vector<1x8x8xf32> to vector<1x8xf32>
    %104 = vector.shape_cast %103 : vector<1x8xf32> to vector<1x8x1xf32>
    %105 = tpu.reciprocal %104 {approx = true} : vector<1x8x1xf32> -> vector<1x8x1xf32>
    %106 = vector.broadcast %105 : vector<1x8x1xf32> to vector<1x8x8xf32>
    %107 = arith.mulf %102, %106 : vector<1x8x8xf32>
    %108 = arith.truncf %107 : vector<1x8x8xf32> to vector<1x8x8xbf16>
    "tpu.trace_start"() <{level = 10 : i32, message = "bqk,bkd->bqd"}> : () -> ()
    %cst_35 = arith.constant dense<0.000000e+00> : vector<1x8x8xf32>
    %109 = tpu.matmul %108, %94, %cst_35 {dimension_numbers = #tpu.dot_dimension_numbers<[2], [1], [1], [2], [0, 0, 0, 1, 1, 2], [0], [0]>} : vector<1x8x8xbf16>, vector<1x8x8xbf16>, vector<1x8x8xf32> -> vector<1x8x8xf32>
    "tpu.trace_stop"() : () -> ()
    %110 = arith.truncf %109 : vector<1x8x8xf32> to vector<1x8x8xbf16>
    %c24 = arith.constant 24 : index
    %c0_36 = arith.constant 0 : index
    %111 = vector.load %arg5[%c24, %c0_36] : memref<32x32xbf16, #tpu.memory_space<vmem>>, vector<8x32xbf16>
    "tpu.trace_start"() <{level = 10 : i32, message = "bqd,de->bqe"}> : () -> ()
    %cst_37 = arith.constant dense<0.000000e+00> : vector<1x8x32xf32>
    %112 = tpu.matmul %110, %111, %cst_37 {dimension_numbers = #tpu.dot_dimension_numbers<[2], [0], [0, 1], [1], [0, 0, 0, 1, 1, 1], [], []>} : vector<1x8x8xbf16>, vector<8x32xbf16>, vector<1x8x32xf32> -> vector<1x8x32xf32>
    "tpu.trace_stop"() : () -> ()
    %113 = arith.addf %91, %112 : vector<1x8x32xf32>
    %cst_38 = arith.constant dense<0.000000e+00> : vector<1x8xf32>
    %114 = vector.multi_reduction <add>, %113, %cst_38 [2] : vector<1x8x32xf32> to vector<1x8xf32>
    %115 = vector.shape_cast %114 : vector<1x8xf32> to vector<1x8x1xf32>
    %cst_39 = arith.constant 3.200000e+01 : f32
    %116 = vector.broadcast %cst_39 : f32 to vector<1x8x1xf32>
    %117 = arith.divf %115, %116 : vector<1x8x1xf32>
    %118 = arith.mulf %113, %113 : vector<1x8x32xf32>
    %cst_40 = arith.constant dense<0.000000e+00> : vector<1x8xf32>
    %119 = vector.multi_reduction <add>, %118, %cst_40 [2] : vector<1x8x32xf32> to vector<1x8xf32>
    %120 = vector.shape_cast %119 : vector<1x8xf32> to vector<1x8x1xf32>
    %cst_41 = arith.constant 3.200000e+01 : f32
    %121 = vector.broadcast %cst_41 : f32 to vector<1x8x1xf32>
    %122 = arith.divf %120, %121 : vector<1x8x1xf32>
    %123 = arith.mulf %117, %117 : vector<1x8x1xf32>
    %124 = arith.subf %122, %123 : vector<1x8x1xf32>
    %cst_42 = arith.constant 0.000000e+00 : f32
    %125 = vector.broadcast %cst_42 : f32 to vector<1x8x1xf32>
    %126 = arith.maximumf %124, %125 : vector<1x8x1xf32>
    %127 = vector.broadcast %117 : vector<1x8x1xf32> to vector<1x8x32xf32>
    %128 = arith.subf %113, %127 : vector<1x8x32xf32>
    %cst_43 = arith.constant 9.99999974E-6 : f32
    %129 = vector.broadcast %cst_43 : f32 to vector<1x8x1xf32>
    %130 = arith.addf %126, %129 : vector<1x8x1xf32>
    %131 = math.rsqrt %130 : vector<1x8x1xf32>
    %132 = vector.broadcast %131 : vector<1x8x1xf32> to vector<1x8x32xf32>
    %133 = arith.mulf %128, %132 : vector<1x8x32xf32>
    %c0_44 = arith.constant 0 : index
    %c0_45 = arith.constant 0 : index
    %134 = vector.load %arg7[%c0_44, %c0_45] : memref<1x32xf32, #tpu.memory_space<vmem>>, vector<1x32xf32>
    %135 = vector.shape_cast %134 : vector<1x32xf32> to vector<1x1x32xf32>
    %136 = vector.broadcast %135 : vector<1x1x32xf32> to vector<1x8x32xf32>
    %137 = arith.mulf %133, %136 : vector<1x8x32xf32>
    %c0_46 = arith.constant 0 : index
    %c0_47 = arith.constant 0 : index
    %138 = vector.load %arg8[%c0_46, %c0_47] : memref<1x32xf32, #tpu.memory_space<vmem>>, vector<1x32xf32>
    %139 = vector.shape_cast %138 : vector<1x32xf32> to vector<1x1x32xf32>
    %140 = vector.broadcast %139 : vector<1x1x32xf32> to vector<1x8x32xf32>
    %141 = arith.addf %137, %140 : vector<1x8x32xf32>
    %142 = arith.truncf %141 : vector<1x8x32xf32> to vector<1x8x32xbf16>
    %c0_48 = arith.constant 0 : index
    %c0_49 = arith.constant 0 : index
    %c0_50 = arith.constant 0 : index
    %143 = vector.load %arg9[%c0_48, %c0_49, %c0_50] : memref<1x8x32xbf16, #tpu.memory_space<vmem>>, vector<1x8x32xbf16>
    tpu.vector_store %arg9[%c0_48, %c0_49, %c0_50], %142 {strides = array<i32>} : memref<1x8x32xbf16, #tpu.memory_space<vmem>>, vector<1x8x32xbf16>,
    return
  }
  func.func @transform_0(%arg0: i32) -> (i32, i32, i32) {
    %c0_i32 = arith.constant 0 : i32
    %c0_i32_0 = arith.constant 0 : i32
    %c0_i32_1 = arith.constant 0 : i32
    return %arg0, %c0_i32, %c0_i32_0 : i32, i32, i32
  }
  func.func @transform_1(%arg0: i32) -> (i32, i32, i32) {
    %c0_i32 = arith.constant 0 : i32
    %c0_i32_0 = arith.constant 0 : i32
    %c0_i32_1 = arith.constant 0 : i32
    return %arg0, %c0_i32, %c0_i32_0 : i32, i32, i32
  }
  func.func @transform_2(%arg0: i32) -> (i32, i32) {
    %c0_i32 = arith.constant 0 : i32
    %c0_i32_0 = arith.constant 0 : i32
    %c0_i32_1 = arith.constant 0 : i32
    return %c0_i32, %c0_i32_0 : i32, i32
  }
  func.func @transform_3(%arg0: i32) -> (i32, i32) {
    %c0_i32 = arith.constant 0 : i32
    %c0_i32_0 = arith.constant 0 : i32
    %c0_i32_1 = arith.constant 0 : i32
    return %c0_i32, %c0_i32_0 : i32, i32
  }
  func.func @transform_4(%arg0: i32) -> (i32, i32) {
    %c0_i32 = arith.constant 0 : i32
    %c0_i32_0 = arith.constant 0 : i32
    %c0_i32_1 = arith.constant 0 : i32
    return %c0_i32, %c0_i32_0 : i32, i32
  }
  func.func @transform_5(%arg0: i32) -> (i32, i32) {
    %c0_i32 = arith.constant 0 : i32
    %c0_i32_0 = arith.constant 0 : i32
    %c0_i32_1 = arith.constant 0 : i32
    return %c0_i32, %c0_i32_0 : i32, i32
  }
  func.func @transform_6(%arg0: i32) -> (i32, i32) {
    %c0_i32 = arith.constant 0 : i32
    %c0_i32_0 = arith.constant 0 : i32
    %c0_i32_1 = arith.constant 0 : i32
    return %c0_i32, %c0_i32_0 : i32, i32
  }
  func.func @transform_7(%arg0: i32) -> (i32, i32) {
    %c0_i32 = arith.constant 0 : i32
    %c0_i32_0 = arith.constant 0 : i32
    %c0_i32_1 = arith.constant 0 : i32
    return %c0_i32, %c0_i32_0 : i32, i32
  }
  func.func @transform_8(%arg0: i32) -> (i32, i32, i32) {
    %c0_i32 = arith.constant 0 : i32
    %c0_i32_0 = arith.constant 0 : i32
    %c0_i32_1 = arith.constant 0 : i32
    return %arg0, %c0_i32, %c0_i32_0 : i32, i32, i32
  }
}

</mosaic_0001>

<bundles_post_ra>
// kernel: tpu_custom_call.1
= control target key start
LH: loop header
LB: loop body
LE: loop exit
PB: predicated region body
PF: predicated region fallthrough
CT: control target
= control target key end

     0   :  { %13 = vsyncpa [#allocation3], 0  ;;  %s2067_s0 = inlined_call_operand.hbm [shape: f32[2,8,32], index: 0, kind: input, shape index: {}]   ;;  %s2068_s1 = inlined_call_operand.vmem [shape: f32[2,1,8], index: 1, kind: input, shape index: {}]   ;;  %s2069_s2 = inlined_call_operand.hbm [shape: bf16[32,96], index: 2, kind: input, shape index: {}]   ;;  %s2070_s3 = inlined_call_operand.vmem [shape: f32[1,96], index: 3, kind: input, shape index: {}]   ;;  %s2071_s4 = inlined_call_operand.hbm [shape: bf16[32,32], index: 4, kind: input, shape index: {}]   ;;  %s2072_s5 = inlined_call_operand.vmem [shape: f32[1,32], index: 5, kind: input, shape index: {}]   ;;  %s2073_s6 = inlined_call_operand.vmem [shape: f32[1,32], index: 6, kind: input, shape index: {}]   ;;  %s2074_s7 = inlined_call_operand.vmem [shape: f32[1,32], index: 7, kind: input, shape index: {}]   ;;  %s2075_s8 = inlined_call_operand.hbm [shape: bf16[2,8,32], index: 8, kind: output, shape index: {}]  }
   0x1   :  { %15 = vsyncpa [#allocation3 + $0x1], 0 }
   0x2   :  { %16 = vsyncpa [#allocation6], 0 }
   0x3   :  { %17 = vsyncpa [#allocation4], 0 }
   0x4   :  { %19 = vsyncpa [#allocation4 + $0x1], 0  ;;  %s1718_s27 = smov 0   ;;  %s1720_s28 = smov 0  }
   0x5   :  { %s1722_s29 = smov 0   ;;  %s1724_s30 = smov 0  }
   0x6 LB: > { %s1739_s9 = sadd.s32 4294967295, %s1652_s30   ;;  %s1239_s10 = sadd.s32 4294967294, %s1652_s30   ;;  %s1652_s30 = sphi %s1724_s30, %s2095_s30   ;;  %s1648_s29 = sphi %s1722_s29, %s2094_s29   ;;  %s1644_s28 = sphi %s1720_s28, %s2093_s28   ;;  %s1640_s27 = sphi %s1718_s27, %s2092_s27  }
   0x7   : > { %p45_p0 = scmp.ne.s32.totalorder %s1644_s28, %s1640_s27  ;;  %p2076_p1 = scmp.eq.s32.totalorder %s1739_s9, 0 }
   0x8   : > { %p227_p3 = scmp.eq.s32.totalorder %s1239_s10, 1  ;;  %p1240_p5 = scmp.ge.s32.totalorder %s1652_s30, 1 }
   0x9   : > { %p1748_p4 = por %p2076_p1, %p45_p0  ;;  %p234_p7 = scmp.lt.s32.totalorder %s1652_s30, 3 }
   0xa   : > { %p1753_p6 = por %p227_p3, %p45_p0  ;;  %s1654_s14 = smov [#allocation5]  }
   0xb   : > { %s2079_s11 = scalar_select %p1748_p4, 1, 0 }
   0xc   : > { %s2080_s12 = scalar_select %p1753_p6, 1, 0 }
   0xd   : > { %p1758_p8 = pnand %p1240_p5, %p234_p7  ;;  %s246_s15 = sshll.u32 %s1654_s14, 4  ;;  %s1762_s15 = int_to_ptr.vmem [resolvable:$true] %s246_s15 }
   0xe   : > { %s1655_s17 = smov [#allocation7]   ;;  %s1496_s21 = scalar_lea.hbm %s2069_s2, 256 }
   0xf   : > { %p1406_p9 = pneg %p1758_p8  ;;  %s262_s18 = sshll.u32 %s1655_s17, 4  ;;  %s1773_s18 = int_to_ptr.vmem [resolvable:$true] %s262_s18 }
  0x10   : > { %p1497_p12 = scmp.ne.s32.totalorder %s2069_s2, %s1496_s21  ;;  %p1503_p5 = scmp.lt.u32.totalorder %s1496_s21, %s2069_s2 }
  0x11   : > { %p1769_p11 = pnand %p1406_p9, %p2076_p1 }
  0x13   : > { %p1498_p13 = pneg %p1769_p11 }
  0x15   : > { %p1499_p0 = pnand %p1498_p13, %p1497_p12 }
  0x17   : > { %p1500_p3 = pneg %p1499_p0 }
  0x19   : > { %p1505_p7 = pnand %p1503_p5, %p1500_p3 }
  0x1b   : > { %1508 = shalt.err (!%p1505_p7)
}
  0x1c   : > { %s1509_s26 = scalar_lea.vmem %s1762_s15, 256  ;;  %p1517_p2 = scmp.lt.s32.totalorder %s1762_s15, %s1762_s15 }
  0x1d   : > { %p1510_p9 = scmp.ne.s32.totalorder %s1762_s15, %s1509_s26  ;;  %p1518_p12 = scmp.lt.s32.totalorder %s1509_s26, %s1509_s26 }
  0x1f   : > { %p1512_p10 = pnand %p1510_p9, %p1498_p13  ;;  %p1519_p0 = por %p1518_p12, %p1517_p2 }
  0x21   : > { %p1513_p1 = pneg %p1512_p10 }
  0x23   : > { %p1520_p6 = pnand %p1519_p0, %p1513_p1 }
  0x25   : > { %1523 = shalt.err (!%p1520_p6)
}
  0x26   : > { %s1656_s10 = smov 64   ;;  %s1657_s14 = smov 4  }
  0x27   : > { %1409 = dma.hbm_to_vmem [thread:$0]  (!%p1769_p11), %s2069_s2, 256, %s1762_s15, [#allocation6], %s1656_s10, %s1656_s10, %s1657_s14  }
  0x28   : > { %s1524_s22 = scalar_lea.hbm %s2071_s4, 256 }
  0x29   : > { %p1525_p2 = scmp.ne.s32.totalorder %s2071_s4, %s1524_s22  ;;  %p1531_p10 = scmp.lt.u32.totalorder %s1524_s22, %s2071_s4 }
  0x2b   : > { %p1527_p1 = pnand %p1525_p2, %p1498_p13 }
  0x2d   : > { %p1528_p6 = pneg %p1527_p1 }
  0x2f   : > { %p1533_p3 = pnand %p1531_p10, %p1528_p6 }
  0x31   : > { %1536 = shalt.err (!%p1533_p3)
}
  0x32   : > { %s1537_s15 = scalar_lea.vmem %s1773_s18, 256  ;;  %p1545_p12 = scmp.lt.s32.totalorder %s1773_s18, %s1773_s18 }
  0x33   : > { %p1538_p5 = scmp.ne.s32.totalorder %s1773_s18, %s1537_s15  ;;  %p1546_p0 = scmp.lt.s32.totalorder %s1537_s15, %s1537_s15 }
  0x35   : > { %p1540_p7 = pnand %p1538_p5, %p1498_p13  ;;  %p1547_p2 = por %p1546_p0, %p1545_p12 }
  0x37   : > { %p1541_p9 = pneg %p1540_p7 }
  0x39   : > { %p1548_p1 = pnand %p1547_p2, %p1541_p9 }
  0x3b   : > { %1551 = shalt.err (!%p1548_p1)
}
  0x3c   : > { %1412 = dma.hbm_to_vmem [thread:$0]  (!%p1769_p11), %s2071_s4, 256, %s1773_s18, [#allocation6], %s1656_s10, %s1656_s10, %s1657_s14  }
  0x3d   : > { %s1828_s20 = sadd.s32 1, %s1652_s30   ;;  %s32_s16 = sadd.s32 1, %s1648_s29 }
  0x3e   : > { %s29_s21 = ssub.s32 %s1652_s30, %s1828_s20  ;;  %p39_p13 = scmp.ne.s32.totalorder %s1648_s29, %s1644_s28 }
  0x3f   : > { %p30_p6 = scmp.eq.s32.totalorder %s29_s21, 0  ;;  %p40_p10 = scmp.eq.s32.totalorder %s1652_s30, 0 }
  0x40   : > { %p2083_p3 = scmp.eq.s32.totalorder %s1739_s9, 1  ;;  %p1423_p7 = scmp.lt.s32.totalorder %s1652_s30, 2 }
  0x41   : > { %s1844_s23 = scalar_select %p30_p6, %s1648_s29, %s32_s16  }
  0x42   : > { %p1838_p5 = por %p2083_p3, %p39_p13  ;;  %p41_p9 = por %p40_p10, %p39_p13 }
  0x43   : > { %s285_s24 = sand.u32 1, %s1648_s29   ;;  %s1245_s18 = sshll.u32 %s1652_s30, 7 }
  0x44   : > { %s2084_s22 = scalar_select %p1838_p5, 1, 0 }
  0x45   : > { %s1244_s25 = sshll.u32 %s285_s24, 3  ;;  %s1851_s26 = scalar_lea.hbm %s2067_s0, %s1245_s18 }
  0x46   : > { %s289_s15 = scalar_lea.vmem [#allocation2], %s1244_s25  ;;  %p1855_p11 = pnand %p1423_p7, %p41_p9 }
  0x47   : > { %s296_s17 = sshll.u32 %s289_s15, 4  ;;  %s286_s16 = scalar_lea.sflag [#allocation3], %s285_s24  ;;  %s1853_s17 = int_to_ptr.vmem [resolvable:$true] %s296_s17 }
  0x48   : > { %s1552_s21 = scalar_lea.hbm %s1851_s26, 128  ;;  %p1554_p0 = pneg %p1855_p11 }
  0x49   : > { %p1553_p12 = scmp.ne.s32.totalorder %s1851_s26, %s1552_s21  ;;  %s1557_s10 = scalar_lea.hbm %s2067_s0, 256 }
  0x4a   : > { %p1558_p13 = scmp.lt.u32.totalorder %s1851_s26, %s2067_s0  ;;  %p1559_p6 = scmp.lt.u32.totalorder %s1557_s10, %s1552_s21 }
  0x4b   : > { %p1555_p2 = pnand %p1554_p0, %p1553_p12  ;;  %p1561_p3 = scmp.lt.u32.totalorder %s1552_s21, %s1851_s26 }
  0x4c   : > { %p1560_p10 = por %p1559_p6, %p1558_p13 }
  0x4d   : > { %p1556_p1 = pneg %p1555_p2 }
  0x4e   : > { %p1562_p7 = por %p1561_p3, %p1560_p10 }
  0x50   : > { %p1563_p9 = pnand %p1562_p7, %p1556_p1 }
  0x52   : > { %1566 = shalt.err (!%p1563_p9)
}
  0x53   : > { %s1567_s24 = scalar_lea.vmem %s1853_s17, 128  ;;  %s1658_s18 = smov [#allocation2]  }
  0x54   : > { %p1568_p12 = scmp.ne.s32.totalorder %s1853_s17, %s1567_s24  ;;  %s1572_s25 = sshll.u32 %s1658_s18, 4  ;;  %s1573_s25 = int_to_ptr.vmem [resolvable:$false] %s1572_s25 }
  0x55   : > { %s1574_s14 = scalar_lea.vmem %s1573_s25, 256  ;;  %p1575_p4 = scmp.lt.s32.totalorder %s1853_s17, %s1573_s25 }
  0x56   : > { %p1570_p2 = pnand %p1568_p12, %p1554_p0  ;;  %p1576_p13 = scmp.lt.s32.totalorder %s1574_s14, %s1567_s24 }
  0x58   : > { %p1571_p5 = pneg %p1570_p2  ;;  %p1577_p6 = por %p1576_p13, %p1575_p4 }
  0x5a   : > { %p1578_p10 = pnand %p1577_p6, %p1571_p5 }
  0x5c   : > { %1581 = shalt.err (!%p1578_p10)
}
  0x5d   : > { %1416 = dma.hbm_to_vmem [thread:$0]  (!%p1855_p11), %s1851_s26, 128, %s1853_s17, %s286_s16  }
  0x5e   : > { %311 = sbr.rel (%p1758_p8) target bundleno = 2682 (0xa7a), region = 52  ;;  %s1887_s21 = sand.u32 (!%p1758_p8), 1, %s1644_s28  }
  0x5f   : > { %s1247_s10 = sshll.u32 (!%p1758_p8), %s1887_s21, 3  ;;  %s314_s15 = scalar_lea.sflag (!%p1758_p8), [#allocation3], %s1887_s21 }
  0x60   : > { %s317_s24 = scalar_lea.vmem (!%p1758_p8), [#allocation2], %s1247_s10  ;;  %p2086_p4 = scmp.ne.s32.totalorder (!%p1758_p8), %s2079_s11, 0 }
  0x65   : > { %1627 = dma.done.wait (%p2086_p4), %s314_s15, 128  }
  0x66   : > { %1629 = vsyncadd (%p2086_p4), %s314_s15, 4294967168  ;;  %p2087_p5 = scmp.eq.s32.totalorder %s1739_s9, 0 }
  0x68   : > { %1631 = dma.done.wait (%p2087_p5), [#allocation6], 512   ;;  %p2088_p11 = pmov %p2087_p5 }
  0x69   : > { %v1659_v0 = vmov 0.0   ;;  %vm1660_vm0 = vmmov 0   ;;  %v1476_v1 = vld [vmem:[#allocation5] sm:$0xff]   ;;  %v1477_v2 = vld [vmem:[#allocation5 + $0x8] sm:$0xff]   ;;  %v1905_v3 = vld [vmem:[%s317_s24] sm:$0xff]  ;;  %vm390_vm1 = vcmask 261120   ;;  %v448_v18 = vlaneseq }
  0x6a   : > { %1633 = vsyncadd (%p2088_p11), [#allocation6], 4294966784  ;;  %1301 = vmatprep.subr.bf16.mxu0 %v1659_v0  ;;  %1305 = vmatprep.mubr.msk.bf16.mxu0 %vm1660_vm0, %v1659_v0  ;;  %v366_v4 = vpack.c.bf16 %v1905_v3, %v1905_v3  ;;  %v1251_v5 = vld [vmem:[%s2070_s3] ss:$0 sm:$0xff]  ;;  %s1661_s26 = smov 64   ;;  %s1662_s17 = smov 96  }
  0x6b   : > { %1309 = vmatprep.subr.bf16.mxu1 %v1659_v0  ;;  %1311 = vmatprep.mubr.msk.bf16.mxu1 %vm1660_vm0, %v1659_v0  ;;  %s1663_s19 = smov 88   ;;  %vm520_vm2 = vcmask 1043456   ;;  %vm456_vm3 = vcmask 64512   ;;  %p361_p8 = scmp.lt.s32.totalorder %s1739_s9, 1  ;;  %v449_v19 = vshrl.u32 %v448_v18, 7  ;;  %vm1125_vm4 = vcmask 257024  }
  0x6c   : > { %1302 = vmatpush3.bf16.msra.mxu0 %v1476_v1  ;;  %s1664_s10 = smov 120   ;;  %s1665_s15 = smov 80   ;;  %v565_v45 = vld [vmem:[#allocation7] sm:$0xf] }
  0x6d   : > { %1303 = vmatprep.subr.bf16.mxu0 %v1659_v0  ;;  %s362_s16 = scalar_select %p361_p8, %s1739_s9, 1  ;;  %v450_v22 = vsub.s32 0, %v449_v19  ;;  %v570_v46 = vsel %vm520_vm2, %v565_v45, 0 }
  0x6e   : > { %s1666_s24 = smov 112   ;;  %s1667_s11 = smov 48  }
  0x6f   : > { %s363_s14 = scalar_lea.vmem %s2068_s1, %s362_s16  ;;  %s1668_s13 = smov 72  }
  0x70   : > { %1304 = vmatpush3.bf16.msra.mxu0 %v1477_v2  ;;  %v437_v20 = vld [vmem:[%s363_s14] sm:$0x1]  ;;  %s1250_s25 = sshll.u32 %s1887_s21, 2  ;;  %s1128_s18 = scalar_lea.sflag [#allocation4], %s1887_s21 }
  0x71   : > { %1315 = vmatprep.subr.bf16.mxu0 %v1659_v0  ;;  %v438_v21 = vmul.f32 -1e+09, %v437_v20  ;;  %p2089_p1 = scmp.ne.s32.totalorder %s2084_s22, 0 }
  0x73   : > { %1306 = vmatmul.mubr.msk.bf16.vlgmr.msra.gmra.mrb[0].mxu0 %vm390_vm1, %v366_v4  ;;  %v1937_v23 = vrot.slane %v438_v21, %v450_v22 }
  0x74   : > { %1317 = vmatprep.mubr.msk.bf16.mxu0 %vm1660_vm0, %v1659_v0 }
 0x146   : > { %v428_v6 = vpop.f32.mrb[0].mxu0 }
 0x147   : > { %v429_v7 = vadd.f32 %v1251_v5, %v428_v6  ;;  %v1307_v8 = vpop.f32.mrb[1].mxu0 }
 0x148   : > { %v431_v9 = vpop.f32.mrb[2].mxu0 }
 0x149   : > { %v1917_v10 = vpack.c.bf16 %v429_v7, %v429_v7  ;;  %v1308_v11 = vpop.f32.mrb[3].mxu0  ;;  %v434_v16 = vmul.f32 0.35355338, %v429_v7 }
 0x14b   : > { %515 = vrot.lane.b32.xlu1 %v1917_v10, %s1661_s26  ;;  %454 = vrot.lane.b32.xlu0 %v1917_v10, %s1662_s17  ;;  %v1926_v17 = vpack.c.bf16 %v434_v16, %v434_v16  ;;  %s1669_s26 = smov 104   ;;  %s1670_s17 = smov 56  }
 0x14f   : > { %616 = vrot.lane.b32.xlu1 %v1917_v10, %s1663_s19  ;;  %s1671_s19 = smov 40  }
 0x1bd   : > { %v516_v12 = vpop.permute.xlu1 %515  ;;  %v455_v13 = vpop.permute.xlu0 %454 }
 0x1be   : > { %v522_v14 = vsel %vm520_vm2, %v516_v12, 0  ;;  %v461_v15 = vsel %vm456_vm3, %v455_v13, 0 }
 0x1bf   : > { %1310 = vmatpush3.bf16.xpose.msra.mxu1 %v461_v15  ;;  %1316 = vmatpush3.bf16.msra.mxu0 %v522_v14 }
 0x1c0   : > { %1327 = vmatprep.subr.bf16.mxu0 %v1659_v0  ;;  %1321 = vmatprep.subr.bf16.mxu1 %v1659_v0 }
 0x1c1   : > { %v617_v35 = vpop.permute.xlu1 %616 }
 0x1c2   : > { %v622_v41 = vsel %vm456_vm3, %v617_v35, 0 }
 0x1c6   : > { %1312 = vmatmul.mubr.msk.bf16.vlgmr.msra.gmra.mrb[0].mxu1 %vm456_vm3, %v1926_v17 }
 0x1c7   : > { %1323 = vmatprep.mubr.msk.bf16.mxu1 %vm1660_vm0, %v1659_v0  ;;  %1322 = vmatpush3.bf16.msra.mxu1 %v570_v46 }
 0x1c8   : > { %1333 = vmatprep.subr.bf16.mxu1 %v1659_v0 }
 0x299   : > { %v497_v24 = vpop.f32.mrb[0].mxu1 }
 0x29a   : > { %v498_v25 = vadd.f32 %v497_v24, %v1937_v23  ;;  %v1313_v26 = vpop.f32.mrb[1].mxu1 }
 0x29b   : > { %v500_v27 = vpop.f32.mrb[2].mxu1 }
 0x29c   : > { %v1314_v28 = vpop.f32.mrb[3].mxu1  ;;  %v503_v29 = vsel %vm456_vm3, %v498_v25, -inf }
 0x29d   : > { %504 = vmax.xlane.f32.xlu0 %v503_v29  ;;  %v725_v29 = vld [vmem:[#allocation7 + $0x4] sm:$0xf] }
 0x32a   : > { %v505_v30 = vpop.xlane.xlu0 %504 }
 0x32b   : > { %v506_v31 = vsub.f32 %v498_v25, %v505_v30  ;;  %v730_v30 = vsel %vm520_vm2, %v725_v29, 0 }
 0x32d   : > { %v507_v32 = vmul.f32 1.442695, %v506_v31 }
 0x32f   : > { %1478 = vpow2.f32 %v507_v32 }
 0x339   : > { %v1479_v33 = vpop.eup %1478 }
 0x33a   : > { %v509_v34 = vsel %vm456_vm3, %v1479_v33, 0.0 }
 0x33b   : > { %510 = vadd.xlane.f32.xlu1 %v509_v34 }
 0x34c   : > { %614 = vrot.lane.b32.xlu1 %v1926_v17, %s1664_s10 }
 0x350   : > { %775 = vrot.lane.b32.xlu1 %v1917_v10, %s1665_s15 }
 0x354   : > { %773 = vrot.lane.b32.xlu1 %v1926_v17, %s1666_s24 }
 0x3c8   : > { %v511_v36 = vpop.xlane.xlu1 %510 }
 0x3c9   : > { %1480 = vrcp.f32 %v511_v36 }
 0x3cc   : > { %v615_v40 = vpop.permute.xlu1 %614 }
 0x3d0   : > { %v776_v42 = vpop.permute.xlu1 %775 }
 0x3d1   : > { %v781_v43 = vsel %vm456_vm3, %v776_v42, 0 }
 0x3d3   : > { %v1481_v37 = vpop.eup %1480 }
 0x3d4   : > { %v513_v38 = vmul.f32 %v1481_v37, %v1479_v33  ;;  %v774_v44 = vpop.permute.xlu1 %773 }
 0x3d6   : > { %v514_v39 = vpack.c.bf16 %v513_v38, %v513_v38 }
 0x3d8   : > { %1318 = vmatmul.mubr.msk.bf16.vlgmr.msra.gmra.mrb[4].mxu0 %vm456_vm3, %v514_v39 }
 0x3d9   : > { %1328 = vmatpush3.bf16.xpose.msra.mxu0 %v622_v41  ;;  %1329 = vmatprep.mubr.msk.bf16.mxu0 %vm1660_vm0, %v1659_v0  ;;  %v884_v41 = vld [vmem:[#allocation7 + $0x8] sm:$0xf] }
 0x3da   : > { %1345 = vmatprep.subr.bf16.mxu0 %v1659_v0  ;;  %v889_v45 = vsel %vm520_vm2, %v884_v41, 0 }
 0x3e0   : > { %1330 = vmatmul.mubr.msk.bf16.vlgmr.msra.gmra.mrb[8].mxu0 %vm456_vm3, %v615_v40 }
 0x3e1   : > { %1346 = vmatpush3.bf16.xpose.msra.mxu0 %v781_v43  ;;  %1347 = vmatprep.mubr.msk.bf16.mxu0 %vm1660_vm0, %v1659_v0 }
 0x3e2   : > { %1351 = vmatprep.subr.bf16.mxu0 %v1659_v0 }
 0x3e8   : > { %1348 = vmatmul.mubr.msk.bf16.vlgmr.msra.gmra.mrb[12].mxu0 %vm456_vm3, %v774_v44 }
 0x3e9   : > { %1353 = vmatprep.mubr.msk.bf16.mxu0 %vm1660_vm0, %v1659_v0 }
 0x4ab   : > { %v558_v47 = vpop.f32.mrb[4].mxu0 }
 0x4ac   : > { %v564_v48 = vpack.c.bf16 %v558_v47, %v558_v47  ;;  %v1319_v49 = vpop.f32.mrb[5].mxu0 }
 0x4ad   : > { %v561_v50 = vpop.f32.mrb[6].mxu0 }
 0x4ae   : > { %v1320_v51 = vpop.f32.mrb[7].mxu0  ;;  %1324 = vmatmul.mubr.msk.bf16.vlgmr.msra.gmra.mrb[4].mxu1 %vm456_vm3, %v564_v48 }
 0x4af   : > { %1335 = vmatprep.mubr.msk.bf16.mxu1 %vm1660_vm0, %v1659_v0 }
 0x4b3   : > { %v658_v52 = vpop.f32.mrb[8].mxu0 }
 0x4b4   : > { %v1331_v53 = vpop.f32.mrb[9].mxu0  ;;  %v659_v62 = vadd.f32 %v658_v52, %v1937_v23 }
 0x4b5   : > { %v661_v54 = vpop.f32.mrb[10].mxu0 }
 0x4b6   : > { %v1332_v55 = vpop.f32.mrb[11].mxu0  ;;  %v664_v63 = vsel %vm456_vm3, %v659_v62, -inf }
 0x4bb   : > { %v817_v56 = vpop.f32.mrb[12].mxu0 }
 0x4bc   : > { %v818_v57 = vadd.f32 %v817_v56, %v1937_v23  ;;  %v1349_v58 = vpop.f32.mrb[13].mxu0 }
 0x4bd   : > { %v820_v59 = vpop.f32.mrb[14].mxu0 }
 0x4be   : > { %v1350_v60 = vpop.f32.mrb[15].mxu0  ;;  %v823_v61 = vsel %vm456_vm3, %v818_v57, -inf }
 0x4bf   : > { %824 = vmax.xlane.f32.xlu0 %v823_v61 }
 0x4d5   : > { %835 = vrot.lane.b32.xlu0 %v1917_v10, %s1667_s11  ;;  %s1271_s11 = sshll.u32 %s1739_s9, 6  ;;  %s1672_s9 = smov [#allocation8]  }
 0x4d6   : > { %s2023_s16 = scalar_lea.hbm %s2075_s8, %s1271_s11 }
 0x4d9   : > { %934 = vrot.lane.b32.xlu0 %v1917_v10, %s1668_s13  ;;  %s360_s13 = scalar_lea.vmem [#allocation8], %s1250_s25  ;;  %s1586_s25 = sshll.u32 %s1672_s9, 4  ;;  %s1587_s25 = int_to_ptr.vmem [resolvable:$false] %s1586_s25 }
 0x4da   : > { %s1588_s10 = scalar_lea.vmem %s1587_s25, 128 }
 0x4dd   : > { %932 = vrot.lane.b32.xlu0 %v1926_v17, %s1669_s26  ;;  %s1141_s26 = sshll.u32 %s360_s13, 4  ;;  %s2025_s26 = int_to_ptr.vmem [resolvable:$true] %s1141_s26 }
 0x4de   : > { %s1582_s14 = scalar_lea.vmem %s2025_s26, 64  ;;  %p1589_p9 = scmp.lt.s32.totalorder %s2025_s26, %s1587_s25 }
 0x4df   : > { %p1583_p0 = scmp.ne.s32.totalorder %s2025_s26, %s1582_s14  ;;  %p1590_p12 = scmp.lt.s32.totalorder %s1588_s10, %s1582_s14 }
 0x4e1   : > { %p1584_p3 = pnand %p1583_p0, %p2089_p1  ;;  %p1591_p2 = por %p1590_p12, %p1589_p9 }
 0x4e3   : > { %p1585_p7 = pneg %p1584_p3 }
 0x4e5   : > { %p1592_p13 = pnand %p1591_p2, %p1585_p7 }
 0x4fc   : > { %665 = vmax.xlane.f32.xlu0 %v664_v63 }
 0x54c   : > { %v825_v1 = vpop.xlane.xlu0 %824 }
 0x54d   : > { %v826_v2 = vsub.f32 %v818_v57, %v825_v1  ;;  %v1043_v57 = vld [vmem:[#allocation7 + $0xc] sm:$0xf] }
 0x54e   : > { %v1048_v60 = vsel %vm520_vm2, %v1043_v57, 0 }
 0x54f   : > { %v827_v4 = vmul.f32 1.442695, %v826_v2  ;;  %v1255_v2 = vld [vmem:[%s2072_s5] ss:$0 sm:$0xff] }
 0x550   : > { %v836_v5 = vpop.permute.xlu0 %835 }
 0x551   : > { %1482 = vpow2.f32 %v827_v4  ;;  %v841_v6 = vsel %vm520_vm2, %v836_v5, 0  ;;  %v446_v4 = vadd.f32 %v1255_v2, %v1905_v3 }
 0x552   : > { %1352 = vmatpush3.bf16.msra.mxu0 %v841_v6 }
 0x553   : > { %1363 = vmatprep.subr.bf16.mxu0 %v1659_v0 }
 0x554   : > { %v935_v9 = vpop.permute.xlu0 %934 }
 0x555   : > { %v940_v21 = vsel %vm456_vm3, %v935_v9, 0 }
 0x558   : > { %v933_v11 = vpop.permute.xlu0 %932 }
 0x55b   : > { %v1483_v7 = vpop.eup %1482 }
 0x55c   : > { %v829_v8 = vsel %vm456_vm3, %v1483_v7, 0.0 }
 0x55d   : > { %830 = vadd.xlane.f32.xlu1 %v829_v8 }
 0x589   : > { %v666_v12 = vpop.xlane.xlu0 %665 }
 0x58a   : > { %v667_v13 = vsub.f32 %v659_v62, %v666_v12 }
 0x58c   : > { %v668_v14 = vmul.f32 1.442695, %v667_v13 }
 0x58e   : > { %1484 = vpow2.f32 %v668_v14 }
 0x598   : > { %v1485_v15 = vpop.eup %1484 }
 0x599   : > { %v670_v16 = vsel %vm456_vm3, %v1485_v15, 0.0 }
 0x59a   : > { %671 = vadd.xlane.f32.xlu1 %v670_v16 }
 0x5ab   : > { %676 = vrot.lane.b32.xlu1 %v1917_v10, %s1670_s17 }
 0x5ea   : > { %v831_v17 = vpop.xlane.xlu1 %830 }
 0x5eb   : > { %1486 = vrcp.f32 %v831_v17 }
 0x5f5   : > { %v1487_v18 = vpop.eup %1486 }
 0x5f6   : > { %v833_v19 = vmul.f32 %v1487_v18, %v1483_v7 }
 0x5f8   : > { %v834_v20 = vpack.c.bf16 %v833_v19, %v833_v19 }
 0x5fa   : > { %1354 = vmatmul.mubr.msk.bf16.vlgmr.msra.gmra.mrb[16].mxu0 %vm456_vm3, %v834_v20 }
 0x5fb   : > { %1364 = vmatpush3.bf16.xpose.msra.mxu0 %v940_v21  ;;  %1365 = vmatprep.mubr.msk.bf16.mxu0 %vm1660_vm0, %v1659_v0 }
 0x602   : > { %1366 = vmatmul.mubr.msk.bf16.vlgmr.msra.gmra.mrb[20].mxu0 %vm456_vm3, %v933_v11 }
 0x627   : > { %v672_v22 = vpop.xlane.xlu1 %671 }
 0x628   : > { %1488 = vrcp.f32 %v672_v22  ;;  %v1268_v22 = vld [vmem:[%s2073_s6] ss:$0 sm:$0xff] }
 0x62b   : > { %v677_v24 = vpop.permute.xlu1 %676 }
 0x62c   : > { %v682_v25 = vsel %vm520_vm2, %v677_v24, 0 }
 0x62d   : > { %1334 = vmatpush3.bf16.msra.mxu1 %v682_v25  ;;  %v1269_v25 = vld [vmem:[%s2074_s7] ss:$0 sm:$0xff] }
 0x62e   : > { %1339 = vmatprep.subr.bf16.mxu1 %v1659_v0 }
 0x632   : > { %v1489_v26 = vpop.eup %1488 }
 0x633   : > { %v674_v27 = vmul.f32 %v1489_v26, %v1485_v15 }
 0x635   : > { %v675_v28 = vpack.c.bf16 %v674_v27, %v674_v27 }
 0x637   : > { %1336 = vmatmul.mubr.msk.bf16.vlgmr.msra.gmra.mrb[8].mxu1 %vm456_vm3, %v675_v28 }
 0x638   : > { %1341 = vmatprep.mubr.msk.bf16.mxu1 %vm1660_vm0, %v1659_v0  ;;  %1340 = vmatpush3.bf16.msra.mxu1 %v730_v30 }
 0x639   : > { %1357 = vmatprep.subr.bf16.mxu1 %v1659_v0 }
 0x6cd   : > { %v877_v31 = vpop.f32.mrb[16].mxu0 }
 0x6ce   : > { %v1355_v32 = vpop.f32.mrb[17].mxu0 }
 0x6cf   : > { %v880_v33 = vpop.f32.mrb[18].mxu0 }
 0x6d0   : > { %v1356_v34 = vpop.f32.mrb[19].mxu0 }
 0x6d5   : > { %v976_v35 = vpop.f32.mrb[20].mxu0 }
 0x6d6   : > { %v977_v36 = vadd.f32 %v976_v35, %v1937_v23  ;;  %v1367_v37 = vpop.f32.mrb[21].mxu0  ;;  %v883_v23 = vpack.c.bf16 %v877_v31, %v877_v31 }
 0x6d7   : > { %v979_v38 = vpop.f32.mrb[22].mxu0 }
 0x6d8   : > { %v1368_v39 = vpop.f32.mrb[23].mxu0  ;;  %v982_v40 = vsel %vm456_vm3, %v977_v36, -inf }
 0x6d9   : > { %983 = vmax.xlane.f32.xlu1 %v982_v40 }
 0x70a   : > { %v718_v42 = vpop.f32.mrb[8].mxu1 }
 0x70b   : > { %v724_v43 = vpack.c.bf16 %v718_v42, %v718_v42  ;;  %v1337_v44 = vpop.f32.mrb[9].mxu1 }
 0x70c   : > { %v721_v46 = vpop.f32.mrb[10].mxu1 }
 0x70d   : > { %v1338_v47 = vpop.f32.mrb[11].mxu1  ;;  %1342 = vmatmul.mubr.msk.bf16.vlgmr.msra.gmra.mrb[4].mxu1 %vm456_vm3, %v724_v43 }
 0x70e   : > { %1358 = vmatpush3.bf16.msra.mxu1 %v889_v45  ;;  %1359 = vmatprep.mubr.msk.bf16.mxu1 %vm1660_vm0, %v1659_v0 }
 0x70f   : > { %1369 = vmatprep.subr.bf16.mxu1 %v1659_v0 }
 0x719   : > { %1360 = vmatmul.mubr.msk.bf16.vlgmr.msra.gmra.mrb[4].mxu1 %vm456_vm3, %v883_v23 }
 0x71a   : > { %1371 = vmatprep.mubr.msk.bf16.mxu1 %vm1660_vm0, %v1659_v0 }
 0x766   : > { %v984_v48 = vpop.xlane.xlu1 %983 }
 0x767   : > { %v985_v49 = vsub.f32 %v977_v36, %v984_v48 }
 0x769   : > { %v986_v50 = vmul.f32 1.442695, %v985_v49 }
 0x76b   : > { %1490 = vpow2.f32 %v986_v50 }
 0x775   : > { %v1491_v51 = vpop.eup %1490 }
 0x776   : > { %v988_v52 = vsel %vm456_vm3, %v1491_v51, 0.0 }
 0x777   : > { %989 = vadd.xlane.f32.xlu0 %v988_v52 }
 0x78d   : > { %994 = vrot.lane.b32.xlu0 %v1917_v10, %s1671_s19 }
 0x804   : > { %v990_v53 = vpop.xlane.xlu0 %989 }
 0x805   : > { %1492 = vrcp.f32 %v990_v53 }
 0x808   : > { %v995_v54 = vpop.permute.xlu0 %994 }
 0x809   : > { %v1000_v55 = vsel %vm520_vm2, %v995_v54, 0 }
 0x80a   : > { %1370 = vmatpush3.bf16.msra.mxu1 %v1000_v55 }
 0x80b   : > { %1375 = vmatprep.subr.bf16.mxu1 %v1659_v0 }
 0x80f   : > { %v1493_v56 = vpop.eup %1492 }
 0x810   : > { %v992_v58 = vmul.f32 %v1493_v56, %v1491_v51 }
 0x812   : > { %v993_v59 = vpack.c.bf16 %v992_v58, %v992_v58 }
 0x814   : > { %1372 = vmatmul.mubr.msk.bf16.vlgmr.msra.gmra.mrb[12].mxu1 %vm456_vm3, %v993_v59 }
 0x815   : > { %1376 = vmatpush3.bf16.msra.mxu1 %v1048_v60  ;;  %1377 = vmatprep.mubr.msk.bf16.mxu1 %vm1660_vm0, %v1659_v0 }
 0x8e7   : > { %v1036_v10 = vpop.f32.mrb[12].mxu1 }
 0x8e8   : > { %v1042_v61 = vpack.c.bf16 %v1036_v10, %v1036_v10  ;;  %v1373_v62 = vpop.f32.mrb[13].mxu1 }
 0x8e9   : > { %v1039_v63 = vpop.f32.mrb[14].mxu1 }
 0x8ea   : > { %v1374_v1 = vpop.f32.mrb[15].mxu1  ;;  %1378 = vmatmul.mubr.msk.bf16.vlgmr.msra.gmra.mrb[4].mxu1 %vm456_vm3, %v1042_v61 }
 0x9bd   : > { %v1084_v5 = vpop.f32.mrb[4].mxu1 }
 0x9be   : > { %v1381_v6 = vadd.f32 %v1084_v5, %v446_v4  ;;  %v1379_v7 = vpop.f32.mrb[5].mxu1 }
 0x9bf   : > { %v1087_v8 = vpop.f32.mrb[6].mxu1 }
 0x9c0   : > { %v1380_v9 = vpop.f32.mrb[7].mxu1  ;;  %v1091_v0 = vsel %vm390_vm1, %v1381_v6, 0.0  ;;  %v1096_v11 = vmul.f32 %v1381_v6, %v1381_v6 }
 0x9c1   : > { %1092 = vadd.xlane.f32.xlu0 %v1091_v0 }
 0x9c2   : > { %v1097_v12 = vsel %vm390_vm1, %v1096_v11, 0.0 }
 0x9c3   : > { %1098 = vadd.xlane.f32.xlu1 %v1097_v12 }
 0xa4e   : > { %v1093_v13 = vpop.xlane.xlu0 %1092 }
 0xa4f   : > { %v1095_v14 = vmul.f32 0.03125, %v1093_v13 }
 0xa50   : > { %v1099_v15 = vpop.xlane.xlu1 %1098 }
 0xa51   : > { %v1101_v16 = vmul.f32 %v1095_v14, %v1095_v14  ;;  %v1100_v17 = vmul.f32 0.03125, %v1099_v15  ;;  %v1104_v20 = vsub.f32 %v1381_v6, %v1095_v14 }
 0xa53   : > { %v1102_v3 = vsub.f32 %v1100_v17, %v1101_v16 }
 0xa55   : > { %v1103_v18 = vmax.f32 %v1102_v3, 0.0 }
 0xa57   : > { %v1105_v19 = vadd.f32 1e-05, %v1103_v18 }
 0xa59   : > { %1494 = vrsqrt.f32 %v1105_v19 }
 0xa63   : > { %v1495_v21 = vpop.eup %1494 }
 0xa64   : > { %v1107_v24 = vmul.f32 %v1495_v21, %v1104_v20 }
 0xa66   : > { %v1115_v26 = vmul.f32 %v1268_v22, %v1107_v24 }
 0xa68   : > { %v1123_v27 = vadd.f32 %v1269_v25, %v1115_v26 }
 0xa6a   : > { %v1124_v28 = vpack.c.bf16 %v1123_v27, %v1123_v27 }
 0xa6c   : > { %1126 = vst.msk [vmem:[%s360_s13] sm:$0xf] %vm1125_vm4, %v1124_v28 }
 0xa6d   : > { %1595 = shalt.err (!%p1592_p13)
}
 0xa6e   : > { %s1596_s21 = scalar_lea.hbm %s2023_s16, 64  ;;  %s1600_s11 = scalar_lea.hbm %s2075_s8, 128 }
 0xa6f   : > { %p1597_p6 = scmp.ne.s32.totalorder %s2023_s16, %s1596_s21  ;;  %p1601_p5 = scmp.lt.u32.totalorder %s2023_s16, %s2075_s8 }
 0xa70   : > { %p1602_p11 = scmp.lt.u32.totalorder %s1600_s11, %s1596_s21  ;;  %p1604_p0 = scmp.lt.u32.totalorder %s1596_s21, %s2023_s16 }
 0xa71   : > { %p1598_p10 = pnand %p1597_p6, %p2089_p1 }
 0xa72   : > { %p1603_p8 = por %p1602_p11, %p1601_p5 }
 0xa73   : > { %p1599_p4 = pneg %p1598_p10 }
 0xa74   : > { %p1605_p3 = por %p1604_p0, %p1603_p8 }
 0xa76   : > { %p1606_p7 = pnand %p1605_p3, %p1599_p4 }
 0xa78   : > { %1609 = shalt.err (!%p1606_p7)
}
 0xa79   : > { %1404 = dma.vmem_to_hbm [thread:$0]  (%p2089_p1), %s2025_s26, 64, %s2023_s16, %s1128_s18  }
 0xa7a PF: > { %s1153_s19 = sand.u32 1, %s1640_s27   ;;  %p2090_p9 = scmp.ne.s32.totalorder %s2080_s12, 0 }
 0xa7b   : > { %p2091_p12 = scmp.ge.s32.totalorder %s1652_s30, 2  ;;  %s1154_s14 = scalar_lea.sflag [#allocation4], %s1153_s19 }
 0xa7d   : > { %p1418_p2 = pnand %p2091_p12, %p2090_p9 }
 0xa7f   : > { %1635 = dma.done.wait (!%p1418_p2), %s1154_s14, 64  }
 0xa80   : > { %1637 = vsyncadd (!%p1418_p2), %s1154_s14, 4294967232  ;;  %p22_p13 = scmp.ge.s32.totalorder %s1828_s20, 4   ;;  %s2092_s27 = smov %s1644_s28 }
 0xa81   : > { %s2093_s28 = smov %s1648_s29  ;;  %s2094_s29 = smov %s1844_s23 }
 0xa82   : > { %s2095_s30 = smov %s1828_s20  ;;  %24 = sbr.rel (!%p22_p13) target bundleno = 6 (0x6), region = 108 }
 0xa89   :  { %1159 = vsyncpa [#allocation3], 1 }
 0xa8a   :  { %1161 = vsyncpa [#allocation3 + $0x1], 1 }
 0xa8b   :  { %1162 = vsyncpa [#allocation6], 1 }
 0xa8c   :  { %1163 = vsyncpa [#allocation4], 1 }
 0xa8d   :  { %1165 = vsyncpa [#allocation4 + $0x1], 1 }

</bundles_post_ra>
